<compile_context>
chip_gen: v5e
topology: v5e:2x2
jax: 0.10.0
libtpu: 0.0.40
codegen_flags: <defaults>
</compile_context>

<pallas_src>
from collections import defaultdict

import jax
import jax.numpy as jnp
from jax import lax
from jax.experimental import pallas as pl
from jax.experimental.pallas import tpu as pltpu

ENTITY_TYPES = {'PERSON': 1, 'PROFESSION': 2, 'ORGANIZATION': 3, 'FAMILY': 4, 'LOCATION': 5}
RELATION_TYPES = {'WORKS_AS': 1, 'MEMBER_OF': 2, 'FOUNDED_BY': 3, 'SPOUSE': 4, 'PARENT_OF': 5,
                  'SIBLING': 6, 'PART_OF': 7, 'WORKPLACE': 8, 'RELATIVE': 9}

# ---------------- model dimensions (small stand-ins, consistent with forward) ---------------
H = 128                                # bert hidden size stand-in for 768 (lane aligned)
NER_HID = 256
NUM_NER = len(ENTITY_TYPES) * 2 + 1    # 11
NUM_REL = len(RELATION_TYPES)          # 9
GAT1_OUT, GAT1_HEADS = 128, 2
GAT2_OUT, GAT2_HEADS = 64, 1
REL_EMB = 32
REL_IN = GAT2_OUT * 2 + REL_EMB + H    # 64*2 + 32 + H = 288
REL_HID = 256
NPAD = 8                               # padded entity-graph size per sample (sublane friendly)
MAX_NBLK = 8                           # samples batched per entity-kernel grid step
MAX_ROW_TILE = 1024                    # fused-MLP row tile cap (fits 32 MiB VMEM at BERT dims)

VMEM_LIMIT = 32 * 1024 * 1024          # explicit budget; safe on v5e/v6e (128 MiB) and v7x (64 MiB)


def _round_up(v, m):
    return ((v + m - 1) // m) * m


def _detect_num_tensorcores():
    """Generation-aware TC count (v7x has 2 TCs/chip; v5e/v6e have 1)."""
    try:
        info = pltpu.get_tpu_info()
        for attr in ('num_cores', 'core_count', 'num_tensorcores', 'tensorcore_count'):
            v = getattr(info, attr, None)
            if isinstance(v, int) and v > 0:
                return v
    except Exception:
        pass
    try:
        kind = jax.devices()[0].device_kind.lower()
        if 'v7' in kind:
            return 2
    except Exception:
        pass
    return 1


_NUM_TC = _detect_num_tensorcores()


def _pick_row_tile(R):
    """Biggest row tile that fits; split only when the chip has >1 TensorCore."""
    Rp8 = _round_up(max(R, 1), 8)
    min_steps = _NUM_TC if (_NUM_TC > 1 and Rp8 >= 16) else 1
    steps = max(min_steps, pl.cdiv(Rp8, MAX_ROW_TILE))
    tile = _round_up(pl.cdiv(Rp8, steps), 8)
    Rp = _round_up(Rp8, tile)
    return tile, Rp


# =========================== kernel 1/3: fused 2-layer MLP ==================================
def _mlp_kernel(x_ref, w1_ref, b1_ref, w2_ref, b2_ref, o_ref):
    # bf16 operands on the MXU, f32 accumulation; bias/ReLU stay f32 (v5e VPU has no bf16 path)
    h = jnp.dot(x_ref[...], w1_ref[...], preferred_element_type=jnp.float32) + b1_ref[...]
    h = jnp.maximum(h, 0.0)                     # ReLU (Dropout is identity at eval)
    o_ref[...] = (jnp.dot(h.astype(jnp.bfloat16), w2_ref[...],
                          preferred_element_type=jnp.float32) + b2_ref[...]).astype(o_ref.dtype)


def fused_mlp(x, mp, dout):
    """x: [R, K] (bf16) -> [R, dout] (bf16) through Linear -> ReLU -> Linear (eval).

    mp holds pre-padded / pre-cast weights: w1 [Kp, Hmid] bf16, b1 [1, Hmid] f32,
    w2 [Hmid, Dp] bf16, b2 [1, Dp] f32 (Kp, Dp multiples of 128).
    """
    R, K = x.shape
    w1, b1, w2, b2 = mp['w1'], mp['b1'], mp['w2'], mp['b2']
    Kp, Hmid = w1.shape
    Dp = w2.shape[1]

    tile, Rp = _pick_row_tile(R)

    xp = x if x.dtype == jnp.bfloat16 else x.astype(jnp.bfloat16)
    if Rp != R or Kp != K:
        xp = jnp.pad(xp, ((0, Rp - R), (0, Kp - K)))   # skipped entirely when already aligned

    out = pl.pallas_call(
        _mlp_kernel,
        out_shape=jax.ShapeDtypeStruct((Rp, Dp), jnp.bfloat16),
        grid=(Rp // tile,),
        in_specs=[
            pl.BlockSpec((tile, Kp), lambda i: (i, 0)),
            # weights/biases: constant index_map -> stay VMEM-resident across the row grid
            pl.BlockSpec((Kp, Hmid), lambda i: (0, 0)),
            pl.BlockSpec((1, Hmid), lambda i: (0, 0)),
            pl.BlockSpec((Hmid, Dp), lambda i: (0, 0)),
            pl.BlockSpec((1, Dp), lambda i: (0, 0)),
        ],
        out_specs=pl.BlockSpec((tile, Dp), lambda i: (i, 0)),
        compiler_params=pltpu.CompilerParams(
            dimension_semantics=("parallel",),
            vmem_limit_bytes=VMEM_LIMIT),
    )(xp, w1, b1, w2, b2)
    return out[:R, :dout]


# ======= kernel 2/3: fused span-pool + type-emb + GAT1 + LN + ELU + GAT2 + LN + ELU =========
def _entity_gat_kernel(seq_ref,                        # [NBLK, S, H]    bf16 per-sample tokens
                       sm_ref,                         # [NBLK, NPAD, S] span-token mask (f32)
                       temb_ref,                       # [NBLK, NPAD, H] entity-type embeddings
                       g1w_ref, g1as_ref, g1ad_ref, g1b_ref, ln1g_ref, ln1b_ref,
                       g2w_ref, g2as_ref, g2ad_ref, g2b_ref, ln2g_ref, ln2b_ref,
                       o_ref,                          # [1, NBLK*NPAD, GAT2_OUT]
                       h1_ref):                        # VMEM scratch [NBLK*NPAD, 256]
    f32 = jnp.float32
    bf16 = jnp.bfloat16
    nblk = sm_ref.shape[0]
    rows = nblk * NPAD

    tok = seq_ref[...]                                 # [NBLK, S, H] bf16
    sm = sm_ref[...]                                   # [NBLK, NPAD, S] f32

    # ---- span attention pooling (batched over NBLK samples; masked matmuls) ----
    # pooling matmuls intentionally use bf16 operands (f32 accumulation) to halve HBM/VMEM traffic
    cnt = jnp.sum(sm, axis=2, keepdims=True)                             # [NBLK, NPAD, 1]
    valid = (cnt > 0.0).astype(f32)                                      # [NBLK, NPAD, 1]
    sm_bf = sm.astype(bf16)
    mean = jnp.einsum('nps,nsh->nph', sm_bf, tok,
                      preferred_element_type=f32) / jnp.maximum(cnt, 1.0)          # [NBLK,NPAD,H]
    scores = jnp.einsum('nph,nsh->nps', mean.astype(bf16), tok,
                        preferred_element_type=f32)                                # [NBLK,NPAD,S]
    scores = jnp.where(sm > 0.0, scores, -1e30)
    mmax = jnp.max(scores, axis=2, keepdims=True)
    ex = jnp.exp(scores - mmax) * sm
    w = ex / jnp.maximum(jnp.sum(ex, axis=2, keepdims=True), 1e-20)
    pooled = jnp.einsum('nps,nsh->nph', w.astype(bf16), tok,
                        preferred_element_type=f32)                                # [NBLK,NPAD,H]
    x0 = (pooled + temb_ref[...]) * valid                                # zero padded entity rows
    x0f = x0.reshape(rows, x0.shape[-1])                                 # [rows, H]

    # ---- block-diagonal adjacency: only entities of the same sample attend to each other ----
    valid_rows = valid.reshape(rows, 1)                                  # [rows, 1]
    col_valid = valid_rows.T                                             # [1, rows]
    ri = lax.broadcasted_iota(jnp.int32, (rows, rows), 0) // NPAD
    ci = lax.broadcasted_iota(jnp.int32, (rows, rows), 1) // NPAD
    adj = jnp.where((ri == ci) & (col_valid > 0.0), 1.0, 0.0)            # [rows, rows]

    # ---- GAT layer 1 (heads=2, concat) -> LayerNorm -> ELU ----
    h_all = jnp.dot(x0f.astype(bf16), g1w_ref[...], preferred_element_type=f32)    # [rows, 256]
    for hd in range(GAT1_HEADS):
        h = h_all[:, hd * GAT1_OUT:(hd + 1) * GAT1_OUT]                  # [rows, 128]
        a_s = g1as_ref[hd:hd + 1, :]
        a_d = g1ad_ref[hd:hd + 1, :]
        ssrc = jnp.sum(h * a_s, axis=-1, keepdims=True)                  # [rows, 1]
        sdst = jnp.sum(h * a_d, axis=-1, keepdims=True)
        e = sdst + ssrc.T                                                # e[i, j], edge j -> i
        e = jnp.where(e > 0, e, 0.2 * e)                                 # LeakyReLU(0.2)
        e = jnp.where(adj > 0.0, e, -1e30)
        m = jnp.max(e, axis=1, keepdims=True)
        p = jnp.exp(e - m) * adj
        alpha = p / jnp.maximum(jnp.sum(p, axis=1, keepdims=True), 1e-20)
        # write each head directly to its 128-lane-aligned slice (no jnp.concatenate copy)
        h1_ref[:, hd * GAT1_OUT:(hd + 1) * GAT1_OUT] = jnp.dot(alpha, h,
                                                               preferred_element_type=f32)
    out1 = h1_ref[...] + g1b_ref[...]
    mu = jnp.mean(out1, axis=-1, keepdims=True)
    var = jnp.mean((out1 - mu) ** 2, axis=-1, keepdims=True)
    y1 = (out1 - mu) * lax.rsqrt(var + 1e-5)
    y1 = y1 * ln1g_ref[...] + ln1b_ref[...]
    x1 = jnp.where(y1 > 0, y1, jnp.exp(y1) - 1.0)                        # ELU

    # ---- GAT layer 2 (heads=1, no concat) -> LayerNorm -> ELU ----
    h2 = jnp.dot(x1.astype(bf16), g2w_ref[...], preferred_element_type=f32)        # [rows, 64]
    ssrc = jnp.sum(h2 * g2as_ref[0:1, :], axis=-1, keepdims=True)
    sdst = jnp.sum(h2 * g2ad_ref[0:1, :], axis=-1, keepdims=True)
    e = sdst + ssrc.T
    e = jnp.where(e > 0, e, 0.2 * e)
    e = jnp.where(adj > 0.0, e, -1e30)
    m = jnp.max(e, axis=1, keepdims=True)
    p = jnp.exp(e - m) * adj
    alpha = p / jnp.maximum(jnp.sum(p, axis=1, keepdims=True), 1e-20)
    out2 = jnp.dot(alpha, h2, preferred_element_type=f32) + g2b_ref[...]
    mu = jnp.mean(out2, axis=-1, keepdims=True)
    var = jnp.mean((out2 - mu) ** 2, axis=-1, keepdims=True)
    y2 = (out2 - mu) * lax.rsqrt(var + 1e-5)
    y2 = y2 * ln2g_ref[...] + ln2b_ref[...]
    x2 = jnp.where(y2 > 0, y2, jnp.exp(y2) - 1.0)
    o_ref[0] = x2 * valid_rows                                           # zero padded rows


def entity_gat_batch(seq_sel, span_mask, temb, params, nblk):
    """NBLK samples per grid step; grid over sample blocks (parallel across TCs on v7x)."""
    NS_pad, S, Hh = seq_sel.shape
    nblocks = NS_pad // nblk
    rows = nblk * NPAD
    D1 = GAT1_HEADS * GAT1_OUT

    out = pl.pallas_call(
        _entity_gat_kernel,
        out_shape=jax.ShapeDtypeStruct((nblocks, rows, GAT2_OUT), jnp.float32),
        grid=(nblocks,),
        in_specs=[
            pl.BlockSpec((nblk, S, Hh), lambda s: (s, 0, 0)),
            pl.BlockSpec((nblk, NPAD, S), lambda s: (s, 0, 0)),
            pl.BlockSpec((nblk, NPAD, Hh), lambda s: (s, 0, 0)),
            # constant index_map -> weights stay VMEM-resident across the sample grid
            pl.BlockSpec((Hh, D1), lambda s: (0, 0)),
            pl.BlockSpec((GAT1_HEADS, GAT1_OUT), lambda s: (0, 0)),
            pl.BlockSpec((GAT1_HEADS, GAT1_OUT), lambda s: (0, 0)),
            pl.BlockSpec((1, D1), lambda s: (0, 0)),
            pl.BlockSpec((1, D1), lambda s: (0, 0)),
            pl.BlockSpec((1, D1), lambda s: (0, 0)),
            pl.BlockSpec((D1, GAT2_OUT), lambda s: (0, 0)),
            pl.BlockSpec((GAT2_HEADS, GAT2_OUT), lambda s: (0, 0)),
            pl.BlockSpec((GAT2_HEADS, GAT2_OUT), lambda s: (0, 0)),
            pl.BlockSpec((1, GAT2_OUT), lambda s: (0, 0)),
            pl.BlockSpec((1, GAT2_OUT), lambda s: (0, 0)),
            pl.BlockSpec((1, GAT2_OUT), lambda s: (0, 0)),
        ],
        out_specs=pl.BlockSpec((1, rows, GAT2_OUT), lambda s: (s, 0, 0)),
        scratch_shapes=[pltpu.VMEM((rows, D1), jnp.float32)],
        compiler_params=pltpu.CompilerParams(
            dimension_semantics=("parallel",),
            vmem_limit_bytes=VMEM_LIMIT),
    )(seq_sel, span_mask, temb,
      params['gat1_w'], params['gat1_asrc'], params['gat1_adst'],
      params['gat1_b'], params['ln1_g'], params['ln1_b'],
      params['gat2_w'], params['gat2_asrc'], params['gat2_adst'],
      params['gat2_b'], params['ln2_g'], params['ln2_b'])
    return out.reshape(NS_pad * NPAD, GAT2_OUT)


# ================================== parameters ==============================================
def _prep_mlp(w1, b1, w2, b2):
    """Pad K/Dout to 128 multiples and cast MXU weights to bf16 ONCE at init."""
    K, _ = w1.shape
    Dout = w2.shape[1]
    Kp = _round_up(K, 128)
    Dp = _round_up(Dout, 128)
    return {
        'w1': jnp.pad(w1, ((0, Kp - K), (0, 0))).astype(jnp.bfloat16),
        'b1': b1.reshape(1, -1).astype(jnp.float32),
        'w2': jnp.pad(w2, ((0, 0), (0, Dp - Dout))).astype(jnp.bfloat16),
        'b2': jnp.pad(b2, (0, Dp - Dout)).reshape(1, -1).astype(jnp.float32),
    }


def init_params(key):
    ks = jax.random.split(key, 16)

    def xavier(k, fan_in, fan_out):
        s = (6.0 / (fan_in + fan_out)) ** 0.5
        return jax.random.uniform(k, (fan_in, fan_out), jnp.float32, -s, s)

    p = {}
    # ner_classifier: Linear(H,256) -> ReLU -> Dropout -> Linear(256, NUM_NER)
    p['ner'] = _prep_mlp(xavier(ks[0], H, NER_HID), jnp.zeros((NER_HID,), jnp.float32),
                         xavier(ks[1], NER_HID, NUM_NER), jnp.zeros((NUM_NER,), jnp.float32))
    # rel_classifier: Linear(64*2+32+H, 256) -> ReLU -> Dropout -> Linear(256, 1)
    p['rel'] = _prep_mlp(xavier(ks[10], REL_IN, REL_HID), jnp.zeros((REL_HID,), jnp.float32),
                         xavier(ks[11], REL_HID, 1), jnp.zeros((1,), jnp.float32))
    # GATConv(H, 128, heads=2, concat=True) + LayerNorm(256)
    D1 = GAT1_HEADS * GAT1_OUT
    p['gat1_w'] = xavier(ks[2], H, D1).astype(jnp.bfloat16)
    p['gat1_asrc'] = 0.1 * jax.random.normal(ks[3], (GAT1_HEADS, GAT1_OUT), jnp.float32)
    p['gat1_adst'] = 0.1 * jax.random.normal(ks[4], (GAT1_HEADS, GAT1_OUT), jnp.float32)
    p['gat1_b'] = jnp.zeros((1, D1), jnp.float32)
    p['ln1_g'] = jnp.ones((1, D1), jnp.float32)
    p['ln1_b'] = jnp.zeros((1, D1), jnp.float32)
    # GATConv(256, 64, heads=1, concat=False) + LayerNorm(64)
    p['gat2_w'] = xavier(ks[5], D1, GAT2_HEADS * GAT2_OUT).astype(jnp.bfloat16)
    p['gat2_asrc'] = 0.1 * jax.random.normal(ks[6], (GAT2_HEADS, GAT2_OUT), jnp.float32)
    p['gat2_adst'] = 0.1 * jax.random.normal(ks[7], (GAT2_HEADS, GAT2_OUT), jnp.float32)
    p['gat2_b'] = jnp.zeros((1, GAT2_OUT), jnp.float32)
    p['ln2_g'] = jnp.ones((1, GAT2_OUT), jnp.float32)
    p['ln2_b'] = jnp.zeros((1, GAT2_OUT), jnp.float32)
    # embeddings (entity_type_emb is hidden-sized so pooled + type_emb is valid, as in the module)
    p['ent_emb'] = 0.02 * jax.random.normal(ks[8], (len(ENTITY_TYPES), H), jnp.float32)
    p['rel_emb'] = 0.02 * jax.random.normal(ks[9], (NUM_REL, REL_EMB), jnp.float32)
    return p


# ============================= jitted array-side stages =====================================
@jax.jit
def _ner_head(seq, nerp):
    """NER logits for all B*S tokens in one fused-MLP pallas_call."""
    B, S, Hh = seq.shape
    x = seq.reshape(B * S, Hh).astype(jnp.bfloat16)     # bf16 activation stream (HBM-read bound)
    out = fused_mlp(x, nerp, NUM_NER)                   # [B*S, NUM_NER] bf16
    return out.reshape(B, S, NUM_NER).astype(jnp.float32)


@jax.jit
def _entity_relation(seq, bidx, starts, lens, tids, i1a, i2a, la, ba, params):
    """Span pooling + GAT (all samples) + relation MLP (all pairs), fully jitted."""
    B, S, Hh = seq.shape
    NS = bidx.shape[0]

    # sample batching: >= _NUM_TC blocks when possible (v7x), big blocks otherwise
    nblk = min(MAX_NBLK, max(1, -(-NS // max(_NUM_TC, 1))))
    NS_pad = _round_up(NS, nblk)
    pad = NS_pad - NS
    if pad:
        bidx = jnp.pad(bidx, (0, pad))
        starts = jnp.pad(starts, ((0, pad), (0, 0)))
        lens = jnp.pad(lens, ((0, pad), (0, 0)))
        tids = jnp.pad(tids, ((0, pad), (0, 0)))

    # span-token masks and type embeddings (all samples, vectorized)
    t = jnp.arange(S, dtype=jnp.int32)[None, None, :]
    span_mask = ((t >= starts[:, :, None]) &
                 (t < (starts + lens)[:, :, None])).astype(jnp.float32)   # [NS_pad, NPAD, S]
    temb = jnp.take(params['ent_emb'], tids, axis=0)                      # [NS_pad, NPAD, H]
    # per-sample sequence rows, gathered once and streamed in bf16
    seq_sel = jnp.take(seq, bidx, axis=0).astype(jnp.bfloat16)            # [NS_pad, S, H]

    xg_flat = entity_gat_batch(seq_sel, span_mask, temb, params, nblk)    # [NS_pad*NPAD, 64]

    # relation scoring: all pairs of all samples in one fused-MLP call
    x1 = jnp.take(xg_flat, i1a, axis=0)
    x2 = jnp.take(xg_flat, i2a, axis=0)
    relemb = jnp.take(params['rel_emb'], la, axis=0)
    clsb = jnp.take(seq[:, 0, :], ba, axis=0)
    pv = jnp.concatenate([x1, x2, relemb, clsb], axis=1).astype(jnp.bfloat16)   # [P, REL_IN]
    scores = fused_mlp(pv, params['rel'], 1)                              # [P, 1] bf16
    return scores.astype(jnp.float32)


# ================================== forward =================================================
def forward(params, sequence_output, rel_data, relation_types, entity_types):
    entity_type_to_idx = {t: i for i, t in enumerate(entity_types)}
    B, S, Hh = sequence_output.shape

    # --- NER head: one batched fused-MLP call over all B*S tokens ---
    ner_logits = _ner_head(sequence_output, params['ner'])

    rel_probs = defaultdict(list)
    rel_logits = []

    # --- host-side metadata only (Python dicts/lists; all array work stays batched) ---
    samples = []
    for batch_idx, sample in enumerate(rel_data or []):
        entities = [e for e in sample['entities'] if 'start' in e and 'end' in e]
        if len(entities) < 2:
            continue
        if len(entities) > NPAD:
            entities = entities[:NPAD]     # TODO(synk): graphs larger than NPAD are truncated
        starts = [0] * NPAD; lens = [0] * NPAD; tids = [0] * NPAD
        id_map = {}
        for i, e in enumerate(entities):
            starts[i] = int(e['start'])
            lens[i] = int(e['end'] - e['start'] + 1)
            # TODO(synk): unknown entity types map to index 0 (PyTorch would index-error on -1)
            tids[i] = max(entity_type_to_idx.get(e['type'], 0), 0)
            id_map[e['id']] = i
        if len(id_map) < 2:
            continue
        samples.append((batch_idx, sample, starts, lens, tids, id_map))

    if samples:
        # pair metadata (host-side)
        p_i1, p_i2, p_lbl, p_b = [], [], [], []
        for s_i, (batch_idx, sample, _, _, _, id_map) in enumerate(samples):
            for (i1, i2), label in zip(sample['pairs'], sample['labels']):
                if i1 not in id_map or i2 not in id_map:
                    continue
                idx1, idx2 = id_map[i1], id_map[i2]
                if relation_types[label] == 'FOUNDED_BY':
                    idx1, idx2 = idx2, idx1
                p_i1.append(s_i * NPAD + idx1)
                p_i2.append(s_i * NPAD + idx2)
                p_lbl.append(label)
                p_b.append(batch_idx)

        if p_i1:
            bidx = jnp.array([s[0] for s in samples], jnp.int32)
            starts = jnp.array([s[2] for s in samples], jnp.int32)
            lens = jnp.array([s[3] for s in samples], jnp.int32)
            tids = jnp.array([s[4] for s in samples], jnp.int32)
            scores = _entity_relation(sequence_output, bidx, starts, lens, tids,
                                      jnp.array(p_i1, jnp.int32), jnp.array(p_i2, jnp.int32),
                                      jnp.array(p_lbl, jnp.int32), jnp.array(p_b, jnp.int32),
                                      params)                             # [P, 1]
            for p_idx, label in enumerate(p_lbl):
                score = scores[p_idx]     # raw logit (original module applies no sigmoid here)
                rel_probs[label].append((score, 1.0))
                rel_logits.append((score, 1.0, label))

    rel_logits_for_metrics = defaultdict(list)
    for score, label, rel_type in rel_logits:
        rel_logits_for_metrics[rel_type].append((score, label))

    # eval path: ner_labels is None and not training -> loss stays None
    return {'ner_logits': ner_logits, 'rel_probs': rel_probs,
            'rel_logits': rel_logits_for_metrics, 'loss': None}


# ==================================== main ==================================================
if __name__ == "__main__":
    key = jax.random.PRNGKey(0)
    pkey, dkey = jax.random.split(key)
    params = init_params(pkey)

    B, S = 2, 16
    # TODO(synk): stand-in for BERT last_hidden_state (pretrained encoder not reimplemented).
    sequence_output = jax.random.normal(dkey, (B, S, H), jnp.float32)

    relation_types = list(RELATION_TYPES.keys())
    entity_types = list(ENTITY_TYPES.keys())

    rel_data = [
        {'entities': [{'id': 'T1', 'start': 1, 'end': 3, 'type': 'PERSON'},
                      {'id': 'T2', 'start': 5, 'end': 6, 'type': 'PROFESSION'},
                      {'id': 'T3', 'start': 8, 'end': 10, 'type': 'ORGANIZATION'}],
         'pairs': [('T1', 'T2'), ('T1', 'T3')],
         'labels': [0, 1]},                      # WORKS_AS, MEMBER_OF
        {'entities': [{'id': 'T1', 'start': 2, 'end': 4, 'type': 'ORGANIZATION'},
                      {'id': 'T2', 'start': 6, 'end': 7, 'type': 'PERSON'}],
         'pairs': [('T1', 'T2')],
         'labels': [2]},                         # FOUNDED_BY (exercises the index swap)
    ]

    out = forward(params, sequence_output, rel_data, relation_types, entity_types)

    jax.block_until_ready(out['ner_logits'])
    for rt, pairs in out['rel_logits'].items():
        for score, lbl in pairs:
            jax.block_until_ready(score)

    assert out['ner_logits'].shape == (B, S, NUM_NER)
    assert bool(jnp.all(jnp.isfinite(out['ner_logits'])))
    assert len(out['rel_logits']) > 0
    print("KERNEL_OK")
</pallas_src>

<mosaic_0001>
module attributes {stable_mosaic.version = 11 : i64} {
  func.func @_mlp_kernel(%arg0: i32, %arg1: memref<32x128xbf16, #tpu.memory_space<vmem>>, %arg2: memref<128x256xbf16, #tpu.memory_space<vmem>>, %arg3: memref<1x256xf32, #tpu.memory_space<vmem>>, %arg4: memref<256x128xbf16, #tpu.memory_space<vmem>>, %arg5: memref<1x128xf32, #tpu.memory_space<vmem>>, %arg6: memref<32x128xbf16, #tpu.memory_space<vmem>>) attributes {dimension_semantics = [#tpu.dimension_semantics<parallel>], iteration_bounds = array<i64: 1>, scalar_prefetch = 0 : i64, scratch_operands = 0 : i64, tpu.core_type = #tpu.core_type<tc>, window_params = [{transform_indices = @transform_0, window_bounds = array<i64: 32, 128>}, {pipeline_mode = #tpu.pipeline_mode<synchronous>, transform_indices = @transform_1, window_bounds = array<i64: 128, 256>}, {pipeline_mode = #tpu.pipeline_mode<synchronous>, transform_indices = @transform_2, window_bounds = array<i64: 1, 256>}, {pipeline_mode = #tpu.pipeline_mode<synchronous>, transform_indices = @transform_3, window_bounds = array<i64: 256, 128>}, {pipeline_mode = #tpu.pipeline_mode<synchronous>, transform_indices = @transform_4, window_bounds = array<i64: 1, 128>}, {transform_indices = @transform_5, window_bounds = array<i64: 32, 128>}]} {
    %c0 = arith.constant 0 : index
    %c0_0 = arith.constant 0 : index
    %0 = vector.load %arg1[%c0, %c0_0] : memref<32x128xbf16, #tpu.memory_space<vmem>>, vector<32x128xbf16>
    %c0_1 = arith.constant 0 : index
    %c0_2 = arith.constant 0 : index
    %1 = vector.load %arg2[%c0_1, %c0_2] : memref<128x256xbf16, #tpu.memory_space<vmem>>, vector<128x256xbf16>
    %cst = arith.constant dense<0.000000e+00> : vector<32x256xf32>
    %2 = tpu.matmul %0, %1, %cst {dimension_numbers = #tpu.dot_dimension_numbers<[1], [0], [0], [1], [0, 0, 1, 1], [], []>} : vector<32x128xbf16>, vector<128x256xbf16>, vector<32x256xf32> -> vector<32x256xf32>
    %c0_3 = arith.constant 0 : index
    %c0_4 = arith.constant 0 : index
    %3 = vector.load %arg3[%c0_3, %c0_4] : memref<1x256xf32, #tpu.memory_space<vmem>>, vector<1x256xf32>
    %4 = vector.broadcast %3 : vector<1x256xf32> to vector<32x256xf32>
    %5 = arith.addf %2, %4 : vector<32x256xf32>
    %cst_5 = arith.constant 0.000000e+00 : f32
    %6 = vector.broadcast %cst_5 : f32 to vector<32x256xf32>
    %7 = arith.maximumf %5, %6 : vector<32x256xf32>
    %8 = arith.truncf %7 : vector<32x256xf32> to vector<32x256xbf16>
    %c0_6 = arith.constant 0 : index
    %c0_7 = arith.constant 0 : index
    %9 = vector.load %arg4[%c0_6, %c0_7] : memref<256x128xbf16, #tpu.memory_space<vmem>>, vector<256x128xbf16>
    %cst_8 = arith.constant dense<0.000000e+00> : vector<32x128xf32>
    %10 = tpu.matmul %8, %9, %cst_8 {dimension_numbers = #tpu.dot_dimension_numbers<[1], [0], [0], [1], [0, 0, 1, 1], [], []>} : vector<32x256xbf16>, vector<256x128xbf16>, vector<32x128xf32> -> vector<32x128xf32>
    %c0_9 = arith.constant 0 : index
    %c0_10 = arith.constant 0 : index
    %11 = vector.load %arg5[%c0_9, %c0_10] : memref<1x128xf32, #tpu.memory_space<vmem>>, vector<1x128xf32>
    %12 = vector.broadcast %11 : vector<1x128xf32> to vector<32x128xf32>
    %13 = arith.addf %10, %12 : vector<32x128xf32>
    %14 = arith.truncf %13 : vector<32x128xf32> to vector<32x128xbf16>
    %c0_11 = arith.constant 0 : index
    %c0_12 = arith.constant 0 : index
    %15 = vector.load %arg6[%c0_11, %c0_12] : memref<32x128xbf16, #tpu.memory_space<vmem>>, vector<32x128xbf16>
    tpu.vector_store %arg6[%c0_11, %c0_12], %14 {strides = array<i32>} : memref<32x128xbf16, #tpu.memory_space<vmem>>, vector<32x128xbf16>,
    return
  }
  func.func @transform_0(%arg0: i32) -> (i32, i32) {
    %c0_i32 = arith.constant 0 : i32
    %c0_i32_0 = arith.constant 0 : i32
    return %arg0, %c0_i32 : i32, i32
  }
  func.func @transform_1(%arg0: i32) -> (i32, i32) {
    %c0_i32 = arith.constant 0 : i32
    %c0_i32_0 = arith.constant 0 : i32
    %c0_i32_1 = arith.constant 0 : i32
    return %c0_i32, %c0_i32_0 : i32, i32
  }
  func.func @transform_2(%arg0: i32) -> (i32, i32) {
    %c0_i32 = arith.constant 0 : i32
    %c0_i32_0 = arith.constant 0 : i32
    %c0_i32_1 = arith.constant 0 : i32
    return %c0_i32, %c0_i32_0 : i32, i32
  }
  func.func @transform_3(%arg0: i32) -> (i32, i32) {
    %c0_i32 = arith.constant 0 : i32
    %c0_i32_0 = arith.constant 0 : i32
    %c0_i32_1 = arith.constant 0 : i32
    return %c0_i32, %c0_i32_0 : i32, i32
  }
  func.func @transform_4(%arg0: i32) -> (i32, i32) {
    %c0_i32 = arith.constant 0 : i32
    %c0_i32_0 = arith.constant 0 : i32
    %c0_i32_1 = arith.constant 0 : i32
    return %c0_i32, %c0_i32_0 : i32, i32
  }
  func.func @transform_5(%arg0: i32) -> (i32, i32) {
    %c0_i32 = arith.constant 0 : i32
    %c0_i32_0 = arith.constant 0 : i32
    return %arg0, %c0_i32 : i32, i32
  }
}

</mosaic_0001>

<bundles_post_ra>
// kernel: _ner_head.1
= control target key start
LH: loop header
LB: loop body
LE: loop exit
PB: predicated region body
PF: predicated region fallthrough
CT: control target
= control target key end

     0   :  { %10 = vsyncpa [#allocation3], 0  ;;  %s704_s0 = inlined_call_operand.vmem [shape: bf16[32,128], index: 0, kind: input, shape index: {}]   ;;  %s705_s1 = inlined_call_operand.hbm [shape: bf16[128,256], index: 1, kind: input, shape index: {}]   ;;  %s706_s2 = inlined_call_operand.vmem [shape: f32[1,256], index: 2, kind: input, shape index: {}]   ;;  %s707_s3 = inlined_call_operand.hbm [shape: bf16[256,128], index: 3, kind: input, shape index: {}]   ;;  %s708_s4 = inlined_call_operand.vmem [shape: f32[1,128], index: 4, kind: input, shape index: {}]   ;;  %s709_s5 = inlined_call_operand.vmem [shape: bf16[32,128], index: 5, kind: output, shape index: {}]  }
   0x1   :  { %s18_s20 = sshll.u32 %s705_s1, 4  ;;  %s19_s20 = int_to_ptr.hbm [resolvable:$true] %s18_s20 }
   0x2   :  { %11 = vsyncpa [#allocation5], 0  ;;  %s644_s21 = smov [#allocation2]   ;;  %s33_s25 = sshll.u32 %s707_s3, 4  ;;  %s34_s25 = int_to_ptr.hbm [resolvable:$true] %s33_s25 }
   0x3   :  { %s20_s22 = sshll.u32 %s644_s21, 4  ;;  %s645_s26 = smov 128   ;;  %s21_s22 = int_to_ptr.vmem [resolvable:$true] %s20_s22 }
   0x4   :  { %s646_s27 = smov 8   ;;  %s647_s28 = smov [#allocation4]  }
   0x5   :  { %26 = dma.hbm_to_vmem [thread:$0]  %s19_s20, 2048, %s21_s22, [#allocation3], %s645_s26, %s645_s26, %s646_s27  }
   0x6   :  { %s35_s29 = sshll.u32 %s647_s28, 4  ;;  %s648_s30 = smov 64   ;;  %s36_s29 = int_to_ptr.vmem [resolvable:$true] %s35_s29 }
   0x7   :  { %s649_s6 = smov 4  }
   0x8   :  { %41 = dma.hbm_to_vmem [thread:$0]  %s34_s25, 2048, %s36_s29, [#allocation5], %s648_s30, %s648_s30, %s649_s6  }
   0x9   :  { %640 = dma.done.wait [#allocation3], 2048  }
   0xa   :  { %641 = vsyncadd [#allocation3], 4294965248 }
   0xb   :  { %642 = dma.done.wait [#allocation5], 2048  }
   0xc   :  { %643 = vsyncadd [#allocation5], 4294965248  ;;  %v470_v0 = vld [vmem:[#allocation2 + $0x70] sm:$0xf]  ;;  %v557_v1 = vld [vmem:[#allocation2 + $0x74] sm:$0xf0] }
   0xd   :  { %v556_v2 = vld [vmem:[#allocation2 + $0x74] sm:$0xf]  ;;  %v471_v3 = vor.u32 %v557_v1, %v470_v0  ;;  %v472_v4 = vld [vmem:[#allocation2 + $0x78] sm:$0xf0]  ;;  %v462_v5 = vld [vmem:[#allocation2 + $0x60] sm:$0xf] }
   0xe   :  { %v555_v6 = vld [vmem:[#allocation2 + $0x64] sm:$0xf0]  ;;  %v475_v7 = vor.u32 %v556_v2, %v472_v4  ;;  %v554_v8 = vld [vmem:[#allocation2 + $0x64] sm:$0xf]  ;;  %v464_v9 = vld [vmem:[#allocation2 + $0x68] sm:$0xf0] }
   0xf   :  { %170 = vmatpush.bf16.msra.mxu0 %v471_v3  ;;  %v463_v10 = vor.u32 %v555_v6, %v462_v5  ;;  %v467_v11 = vor.u32 %v554_v8, %v464_v9  ;;  %v454_v12 = vld [vmem:[#allocation2 + $0x50] sm:$0xf]  ;;  %v553_v13 = vld [vmem:[#allocation2 + $0x54] sm:$0xf0]  ;;  %v552_v14 = vld [vmem:[#allocation2 + $0x54] sm:$0xf] }
  0x10   :  { %189 = vmatpush.bf16.msra.mxu1 %v475_v7  ;;  %v456_v15 = vld [vmem:[#allocation2 + $0x58] sm:$0xf0]  ;;  %v455_v16 = vor.u32 %v553_v13, %v454_v12  ;;  %v446_v18 = vld [vmem:[#allocation2 + $0x40] sm:$0xf]  ;;  %v551_v19 = vld [vmem:[#allocation2 + $0x44] sm:$0xf0] }
  0x11   :  { %v459_v17 = vor.u32 %v552_v14, %v456_v15  ;;  %v550_v20 = vld [vmem:[#allocation2 + $0x44] sm:$0xf]  ;;  %v448_v21 = vld [vmem:[#allocation2 + $0x48] sm:$0xf0]  ;;  %v447_v22 = vor.u32 %v551_v19, %v446_v18  ;;  %v438_v24 = vld [vmem:[#allocation2 + $0x30] sm:$0xf] }
  0x12   :  { %v451_v23 = vor.u32 %v550_v20, %v448_v21  ;;  %v549_v25 = vld [vmem:[#allocation2 + $0x34] sm:$0xf0]  ;;  %v548_v26 = vld [vmem:[#allocation2 + $0x34] sm:$0xf]  ;;  %v440_v27 = vld [vmem:[#allocation2 + $0x38] sm:$0xf0] }
  0x13   :  { %171 = vmatpush.bf16.msra.mxu0 %v463_v10  ;;  %v439_v28 = vor.u32 %v549_v25, %v438_v24  ;;  %v443_v29 = vor.u32 %v548_v26, %v440_v27  ;;  %v430_v30 = vld [vmem:[#allocation2 + $0x20] sm:$0xf]  ;;  %v547_v31 = vld [vmem:[#allocation2 + $0x24] sm:$0xf0]  ;;  %v546_v32 = vld [vmem:[#allocation2 + $0x24] sm:$0xf] }
  0x14   :  { %190 = vmatpush.bf16.msra.mxu1 %v467_v11  ;;  %v432_v33 = vld [vmem:[#allocation2 + $0x28] sm:$0xf0]  ;;  %v431_v34 = vor.u32 %v547_v31, %v430_v30  ;;  %v565_v35 = vld [vmem:[#allocation4 + $0x38] sm:$0xff]  ;;  %v422_v38 = vld [vmem:[#allocation2 + $0x10] sm:$0xf] }
  0x15   :  { %v573_v36 = vld [vmem:[#allocation4 + $0x78] sm:$0xff]  ;;  %v435_v37 = vor.u32 %v546_v32, %v432_v33  ;;  %v544_v40 = vld [vmem:[#allocation2 + $0x14] sm:$0xf]  ;;  %352 = vmatpush.bf16.msra.mxu2 %v565_v35  ;;  %v414_v46 = vld [vmem:[#allocation2] sm:$0xf] }
  0x16   :  { %v545_v39 = vld [vmem:[#allocation2 + $0x14] sm:$0xf0]  ;;  %v424_v41 = vld [vmem:[#allocation2 + $0x18] sm:$0xf0]  ;;  %371 = vmatpush.bf16.msra.mxu3 %v573_v36  ;;  %v564_v42 = vld [vmem:[#allocation4 + $0x30] sm:$0xff] }
  0x17   :  { %172 = vmatpush.bf16.msra.mxu0 %v455_v16  ;;  %v572_v43 = vld [vmem:[#allocation4 + $0x70] sm:$0xff]  ;;  %v423_v44 = vor.u32 %v545_v39, %v422_v38  ;;  %v427_v45 = vor.u32 %v544_v40, %v424_v41  ;;  %v543_v47 = vld [vmem:[#allocation2 + $0x4] sm:$0xf0]  ;;  %v542_v48 = vld [vmem:[#allocation2 + $0x4] sm:$0xf] }
  0x18   :  { %191 = vmatpush.bf16.msra.mxu1 %v459_v17  ;;  %v416_v49 = vld [vmem:[#allocation2 + $0x8] sm:$0xf0]  ;;  %v415_v52 = vor.u32 %v543_v47, %v414_v46  ;;  %v562_v54 = vld [vmem:[#allocation4 + $0x20] sm:$0xff]  ;;  %v561_v58 = vld [vmem:[#allocation4 + $0x18] sm:$0xff] }
  0x19   :  { %353 = vmatpush.bf16.msra.mxu2 %v564_v42  ;;  %v563_v50 = vld [vmem:[#allocation4 + $0x28] sm:$0xff]  ;;  %v419_v53 = vor.u32 %v542_v48, %v416_v49  ;;  %v570_v55 = vld [vmem:[#allocation4 + $0x60] sm:$0xff]  ;;  %v569_v59 = vld [vmem:[#allocation4 + $0x58] sm:$0xff] }
  0x1a   :  { %372 = vmatpush.bf16.msra.mxu3 %v572_v43  ;;  %v571_v51 = vld [vmem:[#allocation4 + $0x68] sm:$0xff]  ;;  %v540_v56 = vld [vmem:[%s704_s0] sm:$0xff]  ;;  %v560_v60 = vld [vmem:[#allocation4 + $0x10] sm:$0xff] }
  0x1b   :  { %173 = vmatpush.bf16.msra.mxu0 %v447_v22  ;;  %v541_v57 = vld [vmem:[%s704_s0 + $0x8] sm:$0xff]  ;;  %v568_v61 = vld [vmem:[#allocation4 + $0x50] sm:$0xff]  ;;  %v558_v0 = vld [vmem:[#allocation4] sm:$0xff] }
  0x1c   :  { %192 = vmatpush.bf16.msra.mxu1 %v451_v23  ;;  %v559_v62 = vld [vmem:[#allocation4 + $0x8] sm:$0xff]  ;;  %v566_v1 = vld [vmem:[#allocation4 + $0x40] sm:$0xff] }
  0x1d   :  { %354 = vmatpush.bf16.msra.mxu2 %v563_v50  ;;  %v567_v63 = vld [vmem:[#allocation4 + $0x48] sm:$0xff]  ;;  %v72_v2 = vld [vmem:[%s706_s2] sm:$0x3] }
  0x1e   :  { %373 = vmatpush.bf16.msra.mxu3 %v571_v51  ;;  %v74_v5 = vperm.slane %v72_v2, 0  ;;  %v75_v6 = vperm.slane %v72_v2, 1  ;;  %v591_v35 = vld [vmem:[%s708_s4] ss:$0 sm:$0xff] }
  0x1f   :  { %174 = vmatpush.bf16.msra.mxu0 %v439_v28 }
  0x20   :  { %193 = vmatpush.bf16.msra.mxu1 %v443_v29 }
  0x21   :  { %355 = vmatpush.bf16.msra.mxu2 %v562_v54 }
  0x22   :  { %374 = vmatpush.bf16.msra.mxu3 %v570_v55 }
  0x23   :  { %175 = vmatpush.bf16.msra.mxu0 %v431_v34 }
  0x24   :  { %194 = vmatpush.bf16.msra.mxu1 %v435_v37 }
  0x25   :  { %356 = vmatpush.bf16.msra.mxu2 %v561_v58 }
  0x26   :  { %375 = vmatpush.bf16.msra.mxu3 %v569_v59 }
  0x27   :  { %176 = vmatpush.bf16.msra.mxu0 %v423_v44 }
  0x28   :  { %195 = vmatpush.bf16.msra.mxu1 %v427_v45 }
  0x29   :  { %357 = vmatpush.bf16.msra.mxu2 %v560_v60 }
  0x2a   :  { %376 = vmatpush.bf16.msra.mxu3 %v568_v61 }
  0x2b   :  { %177 = vmatpush.bf16.msra.mxu0 %v415_v52 }
  0x2c   :  { %196 = vmatpush.bf16.msra.mxu1 %v419_v53 }
  0x2d   :  { %358 = vmatpush.bf16.msra.mxu2 %v559_v62 }
  0x2e   :  { %178 = vmatmul.bf16.vlgmr.msra.gmra.mxu0 %v540_v56  ;;  %377 = vmatpush.bf16.msra.mxu3 %v567_v63 }
  0x2f   :  { %197 = vmatmul.bf16.vlgmr.msra.gmra.mxu1 %v540_v56 }
  0x31   :  { %359 = vmatpush.bf16.msra.mxu2 %v558_v0 }
  0x32   :  { %378 = vmatpush.bf16.msra.mxu3 %v566_v1 }
  0x3e   :  { %183 = vmatmul.bf16.gmra.mxu0 %v541_v57 }
  0x3f   :  { %202 = vmatmul.bf16.gmra.mxu1 %v541_v57 }
  0xab   :  { %v179_v3 = vpop.f32.mrf.mxu0 }
  0xac   :  { %v198_v4 = vpop.f32.mrf.mxu1  ;;  %v180_v7 = vadd.f32 %v179_v3, %v74_v5 }
  0xad   :  { %v199_v8 = vadd.f32 %v198_v4, %v75_v6 }
  0xae   :  { %v208_v13 = vmax.f32 %v180_v7, 0.0 }
  0xaf   :  { %v209_v15 = vmax.f32 %v199_v8, 0.0 }
  0xb3   :  { %v181_v9 = vpop.f32.mrf.mxu0 }
  0xb4   :  { %v182_v10 = vadd.f32 %v181_v9, %v74_v5  ;;  %v200_v11 = vpop.f32.mrf.mxu1 }
  0xb5   :  { %v201_v12 = vadd.f32 %v200_v11, %v75_v6 }
  0xb6   :  { %v210_v14 = vmax.f32 %v182_v10, 0.0 }
  0xb7   :  { %v211_v16 = vmax.f32 %v201_v12, 0.0 }
  0xb8   :  { %v216_v17 = vpack.c.bf16 %v210_v14, %v208_v13 }
  0xb9   :  { %v217_v18 = vpack.c.bf16 %v211_v16, %v209_v15 }
  0xba   :  { %360 = vmatmul.bf16.vlgmr.msra.gmra.mxu2 %v216_v17 }
  0xbb   :  { %379 = vmatmul.bf16.vlgmr.msra.gmra.mxu3 %v217_v18  ;;  %v184_v19 = vpop.f32.mrf.mxu0 }
  0xbc   :  { %v203_v20 = vpop.f32.mrf.mxu1  ;;  %v185_v21 = vadd.f32 %v184_v19, %v74_v5 }
  0xbd   :  { %v204_v22 = vadd.f32 %v203_v20, %v75_v6 }
  0xbe   :  { %v212_v27 = vmax.f32 %v185_v21, 0.0 }
  0xbf   :  { %v213_v29 = vmax.f32 %v204_v22, 0.0 }
  0xc3   :  { %v186_v23 = vpop.f32.mrf.mxu0 }
  0xc4   :  { %v187_v24 = vadd.f32 %v186_v23, %v74_v5  ;;  %v205_v25 = vpop.f32.mrf.mxu1 }
  0xc5   :  { %v206_v26 = vadd.f32 %v205_v25, %v75_v6 }
  0xc6   :  { %v214_v28 = vmax.f32 %v187_v24, 0.0 }
  0xc7   :  { %v215_v30 = vmax.f32 %v206_v26, 0.0 }
  0xc8   :  { %v218_v31 = vpack.c.bf16 %v214_v28, %v212_v27 }
  0xc9   :  { %v219_v32 = vpack.c.bf16 %v215_v30, %v213_v29 }
  0xca   :  { %365 = vmatmul.bf16.gmra.mxu2 %v218_v31 }
  0xcb   :  { %384 = vmatmul.bf16.gmra.mxu3 %v219_v32 }
 0x13d   :  { %v361_v33 = vpop.f32.mrf.mxu2 }
 0x13e   :  { %v380_v34 = vpop.f32.mrf.mxu3  ;;  %v362_v36 = vadd.f32 %v591_v35, %v361_v33 }
 0x140   :  { %v381_v40 = vadd.f32 %v380_v34, %v362_v36 }
 0x145   :  { %v363_v37 = vpop.f32.mrf.mxu2 }
 0x146   :  { %v364_v38 = vadd.f32 %v591_v35, %v363_v37  ;;  %v382_v39 = vpop.f32.mrf.mxu3 }
 0x148   :  { %v383_v41 = vadd.f32 %v382_v39, %v364_v38 }
 0x14a   :  { %v577_v42 = vpack.c.bf16 %v383_v41, %v381_v40 }
 0x14c   :  { %578 = vst [vmem:[%s709_s5] sm:$0xff] %v577_v42  }
 0x14d   :  { %v366_v43 = vpop.f32.mrf.mxu2 }
 0x14e   :  { %v385_v44 = vpop.f32.mrf.mxu3  ;;  %v367_v45 = vadd.f32 %v591_v35, %v366_v43 }
 0x150   :  { %v386_v49 = vadd.f32 %v385_v44, %v367_v45 }
 0x155   :  { %v368_v46 = vpop.f32.mrf.mxu2 }
 0x156   :  { %v369_v47 = vadd.f32 %v591_v35, %v368_v46  ;;  %v387_v48 = vpop.f32.mrf.mxu3 }
 0x158   :  { %v388_v50 = vadd.f32 %v387_v48, %v369_v47 }
 0x15a   :  { %v582_v51 = vpack.c.bf16 %v388_v50, %v386_v49 }
 0x15c   :  { %584 = vst [vmem:[%s709_s5 + $0x8] sm:$0xff] %v582_v51  }
 0x15d   :  { %402 = vsyncpa [#allocation3], 1 }
 0x15e   :  { %403 = vsyncpa [#allocation5], 1 }

</bundles_post_ra>
